<compile_context>
chip_gen: v7x
topology: tpu7x:2x2x1
jax: 0.10.0
libtpu: 0.0.40
codegen_flags: <defaults>
</compile_context>

<pallas_src>
from functools import partial

import jax
import jax.numpy as jnp
from jax.experimental import pallas as pl
from jax.experimental.pallas import tpu as pltpu

EPS = 1e-5
_VMEM_LIMIT = 48 * 1024 * 1024  # <= v7x's 64 MiB physical VMEM; generous on v5e/v6e


def _round_up(n, m):
    return ((n + m - 1) // m) * m


def _stats_kernel(x_ref, stat_ref, *, n_valid, tile_rows, tiles_per_core):
    """Per-channel sum / sum-of-squares.  One (2, H) partial accumulator per core."""
    c = pl.program_id(0)      # core split (parallel axis)
    i = pl.program_id(1)      # row-tile loop for this core (arbitrary axis)

    @pl.when(i == 0)
    def _():
        stat_ref[...] = jnp.zeros_like(stat_ref)

    # Mask rows of the (possibly clamped / ragged) tile that lie beyond N, so no
    # wrapper-side padding of the activations is needed.
    row_start = (c * tiles_per_core + i) * tile_rows
    rows = jax.lax.broadcasted_iota(jnp.int32, (tile_rows, 1), 0) + row_start
    x = jnp.where(rows < n_valid, x_ref[...], 0.0)          # (tile_rows, H) f32

    stat_ref[0:1, :] += jnp.sum(x, axis=0, keepdims=True)        # sum
    stat_ref[1:2, :] += jnp.sum(x * x, axis=0, keepdims=True)    # sum of squares


def _block_kernel(x_ref, stat_ref, gamma_ref, beta_ref,
                  w1_ref, b1_ref, w2_ref, b2_ref, out_ref, *, n_rows):
    x = x_ref[...]                                   # (tn, H) f32

    # Combine the two per-core stat partials and fold BatchNorm (training-mode
    # batch stats, biased variance) into a per-channel scale/shift.
    stat = stat_ref[0] + stat_ref[1]                 # (2, H)
    inv_n = 1.0 / n_rows
    mean = stat[0:1, :] * inv_n                      # (1, H)
    ex2 = stat[1:2, :] * inv_n                       # (1, H)
    var = jnp.maximum(ex2 - mean * mean, 0.0)        # clamp: cancellation guard
    scale = gamma_ref[...] * jax.lax.rsqrt(var + EPS)
    shift = beta_ref[...] - mean * scale
    hn = x * scale + shift                           # BN in f32

    # Linear -> ReLU -> (Dropout identity) -> Linear.  MXU in bf16, f32 accumulation.
    z = jnp.dot(hn.astype(jnp.bfloat16), w1_ref[...],
                preferred_element_type=jnp.float32) + b1_ref[...]
    z = jnp.maximum(z, 0.0)
    # TODO(synk): Dropout with p > 0 (training mode) would need pltpu.prng_seed /
    # pltpu.prng_random_bits in the kernel; here do == 0.0 so it is an identity.
    h = jnp.dot(z.astype(jnp.bfloat16), w2_ref[...],
                preferred_element_type=jnp.float32) + b2_ref[...]

    out_ref[...] = h + x                             # residual in f32


def prepare_params(params):
    """One-time parameter prep (hoisted out of the per-call path): bf16 matmul
    weights, (1, dim) rows for BN params and biases."""
    return {
        "gamma": params["gamma"].reshape(1, -1).astype(jnp.float32),
        "beta": params["beta"].reshape(1, -1).astype(jnp.float32),
        "w1": params["w1"].astype(jnp.bfloat16),       # (H, L), x @ W layout
        "b1": params["b1"].reshape(1, -1).astype(jnp.float32),
        "w2": params["w2"].astype(jnp.bfloat16),       # (L, H)
        "b2": params["b2"].reshape(1, -1).astype(jnp.float32),
    }


def resnet_block_forward(x, prepared, *, row_tile=1024, stats_row_tile=4096):
    """x: (B, T, emb_dim) f32 -> (B, T, emb_dim) f32 (training-mode BatchNorm)."""
    B, T, H = x.shape
    L = prepared["w1"].shape[1]
    N = B * T
    xf = x.reshape(N, H).astype(jnp.float32)         # free reshape; no pad copy

    # ---------- pass 1: per-channel sum / sum-of-squares, split over 2 cores ----------
    # Cap the stats tile so x's double-buffered block stays within ~half the VMEM budget.
    max_tsn = max(8, ((_VMEM_LIMIT // 2) // (H * 4 * 2)) // 8 * 8)
    tsn = min(stats_row_tile, max_tsn, _round_up(N, 8))
    n_stat_tiles = pl.cdiv(N, tsn)
    half = pl.cdiv(n_stat_tiles, 2)                  # tiles per core; extras are masked

    stats = pl.pallas_call(
        partial(_stats_kernel, n_valid=N, tile_rows=tsn, tiles_per_core=half),
        out_shape=jax.ShapeDtypeStruct((2, 2, H), jnp.float32),   # per-core partials
        grid=(2, half),
        in_specs=[pl.BlockSpec(
            (tsn, H),
            # Clamp the block index into range; out-of-range logical tiles are
            # fully masked inside the kernel so they contribute zero.
            lambda c, i: (jnp.minimum(c * half + i, n_stat_tiles - 1), 0))],
        out_specs=pl.BlockSpec((None, 2, H), lambda c, i: (c, 0, 0)),
        compiler_params=pltpu.CompilerParams(
            dimension_semantics=("parallel", "arbitrary"),
            vmem_limit_bytes=_VMEM_LIMIT),
    )(xf)

    # ---------- pass 2: fused BN + Linear + ReLU + Linear + residual ----------
    # Cap the row tile from the VMEM budget and guarantee >= 2 tiles (both v7x cores).
    max_tn = max(8, ((_VMEM_LIMIT // 2) // (H * 4 * 4)) // 8 * 8)
    tn = max(8, min(row_tile, max_tn, _round_up(pl.cdiv(N, 2), 8)))
    n_tiles = pl.cdiv(N, tn)

    out = pl.pallas_call(
        partial(_block_kernel, n_rows=float(N)),
        out_shape=jax.ShapeDtypeStruct((N, H), jnp.float32),     # no output slice copy
        grid=(n_tiles,),
        in_specs=[
            pl.BlockSpec((tn, H), lambda i: (i, 0)),        # x tile
            pl.BlockSpec((2, 2, H), lambda i: (0, 0, 0)),   # stats partials (constant)
            pl.BlockSpec((1, H), lambda i: (0, 0)),         # gamma
            pl.BlockSpec((1, H), lambda i: (0, 0)),         # beta
            pl.BlockSpec((H, L), lambda i: (0, 0)),         # w1 (bf16)
            pl.BlockSpec((1, L), lambda i: (0, 0)),         # b1
            pl.BlockSpec((L, H), lambda i: (0, 0)),         # w2 (bf16)
            pl.BlockSpec((1, H), lambda i: (0, 0)),         # b2
        ],
        out_specs=pl.BlockSpec((tn, H), lambda i: (i, 0)),
        compiler_params=pltpu.CompilerParams(
            dimension_semantics=("parallel",),              # row tiles across v7x cores
            vmem_limit_bytes=_VMEM_LIMIT),
    )(xf, stats, prepared["gamma"], prepared["beta"],
      prepared["w1"], prepared["b1"], prepared["w2"], prepared["b2"])

    return out.reshape(B, T, H)


def make_params(key, emb_dim, latent_dim):
    ks = jax.random.split(key, 6)
    s = 0.1
    # Linear weights stored pre-transposed to (in, out) so the kernel does x @ W.
    return {
        "gamma": 1.0 + s * jax.random.normal(ks[0], (1, emb_dim), jnp.float32),
        "beta": s * jax.random.normal(ks[1], (1, emb_dim), jnp.float32),
        "w1": s * jax.random.normal(ks[2], (emb_dim, latent_dim), jnp.float32),
        "b1": s * jax.random.normal(ks[3], (1, latent_dim), jnp.float32),
        "w2": s * jax.random.normal(ks[4], (latent_dim, emb_dim), jnp.float32),
        "b2": s * jax.random.normal(ks[5], (1, emb_dim), jnp.float32),
    }


def resnet_block_reference(x, params):
    """Pure-JAX f32 reference of the PyTorch ResNetBlock forward (training-mode BN)."""
    B, T, H = x.shape
    v = x.reshape(B * T, H)
    m = v.mean(axis=0, keepdims=True)
    var = ((v - m) ** 2).mean(axis=0, keepdims=True)     # biased variance
    hn = (v - m) / jnp.sqrt(var + EPS) * params["gamma"] + params["beta"]
    z = jnp.maximum(hn @ params["w1"] + params["b1"], 0.0)
    h = z @ params["w2"] + params["b2"] + v
    return h.reshape(B, T, H)


if __name__ == "__main__":
    B, T = 2, 8
    emb_dim, latent_dim, do = 32, 64, 0.0   # do=0.0 -> Dropout is identity

    key = jax.random.PRNGKey(0)
    kx, kp = jax.random.split(key)
    x = jax.random.normal(kx, (B, T, emb_dim), jnp.float32)
    params = make_params(kp, emb_dim, latent_dim)
    prepared = prepare_params(params)       # one-time weight cast / layout prep

    out = resnet_block_forward(x, prepared)
    out = jax.block_until_ready(out)

    ref = resnet_block_reference(x, params)
    assert out.shape == (B, T, emb_dim)
    # Tolerance relaxed vs the pure-f32 reference because matmul operands are bf16
    # (accumulation, BatchNorm, and the residual remain f32).
    assert jnp.allclose(out, ref, atol=5e-2, rtol=5e-2), "mismatch vs JAX reference"

    print("KERNEL_OK")
</pallas_src>

<mosaic_0001>
module attributes {stable_mosaic.version = 11 : i64} {
  func.func @_stats_kernel(%arg0: i32, %arg1: i32, %arg2: memref<16x32xf32, #tpu.memory_space<vmem>>, %arg3: memref<1x2x32xf32, #tpu.memory_space<vmem>>) attributes {dimension_semantics = [#tpu.dimension_semantics<parallel>, #tpu.dimension_semantics<arbitrary>], iteration_bounds = array<i64: 2, 1>, scalar_prefetch = 0 : i64, scratch_operands = 0 : i64, tpu.core_type = #tpu.core_type<tc>, window_params = [{transform_indices = @transform_0, window_bounds = array<i64: 16, 32>}, {transform_indices = @transform_1, window_bounds = array<i64: 1, 2, 32>}]} {
    %c0_i32 = arith.constant 0 : i32
    %0 = arith.cmpi eq, %arg1, %c0_i32 : i32
    %1 = arith.extui %0 : i1 to i32
    %c0_i32_0 = arith.constant 0 : i32
    %2 = arith.cmpi ne, %1, %c0_i32_0 : i32
    scf.if %2 {
      %cst_16 = arith.constant 0.000000e+00 : f32
      %33 = vector.broadcast %cst_16 : f32 to vector<2x32xf32>
      %c0_17 = arith.constant 0 : index
      %c0_18 = arith.constant 0 : index
      %c0_19 = arith.constant 0 : index
      %34 = vector.load %arg3[%c0_17, %c0_18, %c0_19] : memref<1x2x32xf32, #tpu.memory_space<vmem>>, vector<1x2x32xf32>
      %35 = vector.shape_cast %34 : vector<1x2x32xf32> to vector<2x32xf32>
      %36 = vector.shape_cast %33 : vector<2x32xf32> to vector<1x2x32xf32>
      tpu.vector_store %arg3[%c0_17, %c0_18, %c0_19], %36 {strides = array<i32>} : memref<1x2x32xf32, #tpu.memory_space<vmem>>, vector<1x2x32xf32>,
    } else {
    }
    %c1_i32 = arith.constant 1 : i32
    %3 = arith.muli %arg0, %c1_i32 : i32
    %4 = arith.addi %3, %arg1 : i32
    %c16_i32 = arith.constant 16 : i32
    %5 = arith.muli %4, %c16_i32 : i32
    %6 = tpu.iota {dimensions = array<i32: 0>} : vector<16x1xi32>
    %7 = vector.broadcast %5 : i32 to vector<16x1xi32>
    %8 = arith.addi %6, %7 : vector<16x1xi32>
    %c16_i32_1 = arith.constant 16 : i32
    %9 = vector.broadcast %c16_i32_1 : i32 to vector<16x1xi32>
    %10 = arith.cmpi slt, %8, %9 : vector<16x1xi32>
    %c0 = arith.constant 0 : index
    %c0_2 = arith.constant 0 : index
    %11 = vector.load %arg2[%c0, %c0_2] : memref<16x32xf32, #tpu.memory_space<vmem>>, vector<16x32xf32>
    %cst = arith.constant 0.000000e+00 : f32
    %12 = vector.shape_cast %10 : vector<16x1xi1> to vector<16x1xi1>
    %13 = vector.broadcast %12 : vector<16x1xi1> to vector<16x32xi1>
    %14 = vector.broadcast %cst : f32 to vector<16x32xf32>
    %15 = arith.select %13, %11, %14 : vector<16x32xi1>, vector<16x32xf32>
    %c0_3 = arith.constant 0 : index
    %c0_4 = arith.constant 0 : index
    %c0_5 = arith.constant 0 : index
    %16 = vector.load %arg3[%c0_3, %c0_4, %c0_5] : memref<1x2x32xf32, #tpu.memory_space<vmem>>, vector<1x1x32xf32>
    %17 = vector.shape_cast %16 : vector<1x1x32xf32> to vector<1x32xf32>
    %cst_6 = arith.constant dense<0.000000e+00> : vector<32xf32>
    %18 = vector.multi_reduction <add>, %15, %cst_6 [0] : vector<16x32xf32> to vector<32xf32>
    %19 = vector.shape_cast %18 : vector<32xf32> to vector<1x32xf32>
    %20 = arith.addf %17, %19 : vector<1x32xf32>
    %c0_7 = arith.constant 0 : index
    %c0_8 = arith.constant 0 : index
    %c0_9 = arith.constant 0 : index
    %21 = vector.load %arg3[%c0_7, %c0_8, %c0_9] : memref<1x2x32xf32, #tpu.memory_space<vmem>>, vector<1x1x32xf32>
    %22 = vector.shape_cast %21 : vector<1x1x32xf32> to vector<1x32xf32>
    %23 = vector.shape_cast %20 : vector<1x32xf32> to vector<1x1x32xf32>
    tpu.vector_store %arg3[%c0_7, %c0_8, %c0_9], %23 {strides = array<i32>} : memref<1x2x32xf32, #tpu.memory_space<vmem>>, vector<1x1x32xf32>,
    %c0_10 = arith.constant 0 : index
    %c1 = arith.constant 1 : index
    %c0_11 = arith.constant 0 : index
    %24 = vector.load %arg3[%c0_10, %c1, %c0_11] : memref<1x2x32xf32, #tpu.memory_space<vmem>>, vector<1x1x32xf32>
    %25 = vector.shape_cast %24 : vector<1x1x32xf32> to vector<1x32xf32>
    %26 = arith.mulf %15, %15 : vector<16x32xf32>
    %cst_12 = arith.constant dense<0.000000e+00> : vector<32xf32>
    %27 = vector.multi_reduction <add>, %26, %cst_12 [0] : vector<16x32xf32> to vector<32xf32>
    %28 = vector.shape_cast %27 : vector<32xf32> to vector<1x32xf32>
    %29 = arith.addf %25, %28 : vector<1x32xf32>
    %c0_13 = arith.constant 0 : index
    %c1_14 = arith.constant 1 : index
    %c0_15 = arith.constant 0 : index
    %30 = vector.load %arg3[%c0_13, %c1_14, %c0_15] : memref<1x2x32xf32, #tpu.memory_space<vmem>>, vector<1x1x32xf32>
    %31 = vector.shape_cast %30 : vector<1x1x32xf32> to vector<1x32xf32>
    %32 = vector.shape_cast %29 : vector<1x32xf32> to vector<1x1x32xf32>
    tpu.vector_store %arg3[%c0_13, %c1_14, %c0_15], %32 {strides = array<i32>} : memref<1x2x32xf32, #tpu.memory_space<vmem>>, vector<1x1x32xf32>,
    return
  }
  func.func @transform_0(%arg0: i32, %arg1: i32) -> (i32, i32) {
    %c1_i32 = arith.constant 1 : i32
    %0 = arith.muli %arg0, %c1_i32 : i32
    %1 = arith.addi %0, %arg1 : i32
    %c0_i32 = arith.constant 0 : i32
    %2 = arith.minsi %1, %c0_i32 : i32
    %c0_i32_0 = arith.constant 0 : i32
    %c0_i32_1 = arith.constant 0 : i32
    return %2, %c0_i32_0 : i32, i32
  }
  func.func @transform_1(%arg0: i32, %arg1: i32) -> (i32, i32, i32) {
    %c0_i32 = arith.constant 0 : i32
    %c0_i32_0 = arith.constant 0 : i32
    %c0_i32_1 = arith.constant 0 : i32
    return %arg0, %c0_i32, %c0_i32_0 : i32, i32, i32
  }
}

</mosaic_0001>

<bundles_post_ra>
// kernel: tpu_custom_call.1
= control target key start
LH: loop header
LB: loop body
LE: loop exit
PB: predicated region body
PF: predicated region fallthrough
CT: control target
= control target key end

     0   :  { %6 = vsyncpa [#allocation3], 0  ;;  %s733_s0 = inlined_call_operand.hbm [shape: f32[16,32], index: 0, kind: input, shape index: {}]   ;;  %s734_s1 = inlined_call_operand.hbm [shape: f32[2,2,32], index: 1, kind: output, shape index: {}]  }
   0x1   :  { %8 = vsyncpa [#allocation3 + $0x1], 0 }
   0x2   :  { %9 = vsyncpa [#allocation4], 0 }
   0x3   :  { %11 = vsyncpa [#allocation4 + $0x1], 0  ;;  %s559_s6 = smov 0   ;;  %s561_s7 = smov 0  }
   0x4   :  { %s563_s8 = smov 0   ;;  %s565_s9 = smov 0  }
   0x5   :  { %s567_s10 = smov 0   ;;  %s569_s11 = smov 0  }
   0x6   :  { %s571_s12 = smov 0   ;;  %s573_s13 = smov 0  }
   0x7 LB: > { %s304_s14 = sadd.s32 4294967295, %s542_s13   ;;  %s305_s15 = sadd.s32 4294967294, %s542_s13   ;;  %s542_s13 = sphi %s573_s13, %s17_s13   ;;  %s538_s12 = sphi %s571_s12, %s753_s12   ;;  %s534_s11 = sphi %s569_s11, %s752_s11   ;;  %s530_s10 = sphi %s567_s10, %s723_s10   ;;  %s526_s9 = sphi %s565_s9, %s751_s9   ;;  %s522_s8 = sphi %s563_s8, %s750_s8   ;;  %s518_s7 = sphi %s561_s7, %s749_s7   ;;  %s514_s6 = sphi %s559_s6, %s748_s6  }
   0x8   : > { %s29_s16 = sadd.s32 1, %s538_s12  ;;  %p511_p1 = scmp.ne.s32.totalorder %s530_s10, 0 }
   0x9   : > { %p31_p0 = scmp.ge.s32.totalorder %s29_s16, 2  ;;  %p50_p2 = scmp.eq.s32.totalorder %s542_s13, 0 }
   0xa   : > { %p55_p3 = scmp.ne.s32.totalorder %s530_s10, %s526_s9  ;;  %p56_p5 = scmp.eq.s32.totalorder %s304_s14, 0 }
   0xb   : > { %s755_s16 = smov (%p31_p0, %s29_s16), 0  ;;  %p605_p4 = por %p511_p1, %p50_p2 }
   0xc   : > { %p609_p6 = por %p56_p5, %p55_p3  ;;  %s65_s19 = ssub.s32 %s538_s12, %s755_s16 }
   0xd   : > { %p66_p7 = scmp.eq.s32.totalorder %s65_s19, 0  ;;  %s68_s20 = sadd.s32 1, %s522_s8 }
   0xe   : > { %s739_s18 = scalar_select %p609_p6, 1, 0 }
   0xf   : > { %s617_s21 = scalar_select %p66_p7, %s522_s8, %s68_s20  }
  0x10   : > { %p78_p8 = scmp.ne.s32.totalorder %s522_s8, %s518_s7  ;;  %p79_p9 = scmp.eq.s32.totalorder %s304_s14, 1 }
  0x11   : > { %p84_p10 = scmp.ne.s32.totalorder %s518_s7, %s514_s6  ;;  %p85_p11 = scmp.eq.s32.totalorder %s305_s15, 1 }
  0x12   : > { %p623_p12 = por %p79_p9, %p78_p8  ;;  %p332_p1 = scmp.lt.s32.totalorder %s542_s13, 2 }
  0x13   : > { %p628_p0 = por %p85_p11, %p84_p10  ;;  %s544_s24 = smov [#allocation2]  }
  0x14   : > { %s740_s22 = scalar_select %p623_p12, 1, 0 }
  0x15   : > { %s741_s23 = scalar_select %p628_p0, 1, 0 }
  0x16   : > { %s119_s25 = sshll.u32 %s544_s24, 4  ;;  %p635_p2 = pnand %p332_p1, %p605_p4  ;;  %s120_s25 = int_to_ptr.vmem [resolvable:$true] %s119_s25 }
  0x17   : > { %s409_s29 = scalar_lea.hbm %s733_s0, 256 }
  0x18   : > { %s742_s26 = scalar_select %p635_p2, 1, 0 }
  0x19   : > { %p410_p3 = scmp.ne.s32.totalorder %s733_s0, %s409_s29  ;;  %p411_p5 = pneg %p635_p2 }
  0x1a   : > { %p416_p9 = scmp.lt.u32.totalorder %s409_s29, %s409_s29  ;;  %p418_p4 = scmp.lt.u32.totalorder %s409_s29, %s733_s0 }
  0x1b   : > { %p412_p7 = pnand %p411_p5, %p410_p3 }
  0x1c   : > { %p419_p10 = por %p418_p4, %p416_p9 }
  0x1d   : > { %p413_p8 = pneg %p412_p7 }
  0x1f   : > { %p420_p11 = pnand %p419_p10, %p413_p8 }
  0x21   : > { %423 = shalt.err (!%p420_p11)
}
  0x22   : > { %s424_s5 = scalar_lea.vmem %s120_s25, 256  ;;  %s431_s9 = scalar_lea.vmem %s120_s25, 512 }
  0x23   : > { %p425_p1 = scmp.ne.s32.totalorder %s120_s25, %s424_s5  ;;  %p432_p12 = scmp.lt.s32.totalorder %s120_s25, %s120_s25 }
  0x24   : > { %p433_p6 = scmp.lt.s32.totalorder %s431_s9, %s424_s5 }
  0x25   : > { %p427_p13 = pnand %p425_p1, %p411_p5 }
  0x26   : > { %p434_p2 = por %p433_p6, %p432_p12 }
  0x27   : > { %p428_p0 = pneg %p427_p13 }
  0x29   : > { %p435_p3 = pnand %p434_p2, %p428_p0 }
  0x2b   : > { %438 = shalt.err (!%p435_p3)
}
  0x2c   : > { %s545_s14 = smov 128   ;;  %s546_s15 = smov 8  }
  0x2d   : > { %p743_p7 = scmp.ne.s32.totalorder %s742_s26, 0  ;;  %p311_p8 = scmp.ge.s32.totalorder %s542_s13, 1 }
  0x2e   : > { %p127_p9 = scmp.lt.s32.totalorder %s542_s13, 3 }
  0x2f   : > { %327 = dma.hbm_to_vmem [thread:$0]  (!%p743_p7), %s733_s0, 256, %s120_s25, [#allocation3], %s545_s14, %s545_s14, %s546_s15  }
  0x30   : > { %p128_p5 = pnand %p311_p8, %p127_p9 }
  0x31   : > { %s133_s20 = sand.u32 (!%p128_p5), 1, %s530_s10   ;;  %p744_p6 = scmp.ne.s32.totalorder (!%p128_p5), %s739_s18, 0 }
  0x32   : > { %131 = sbr.rel (%p128_p5) target bundleno = 101 (0x65), region = 24  ;;  %s312_s24 = sshll.u32 (!%p128_p5), %s133_s20, 4 }
  0x33   : > { %s134_s27 = scalar_lea.sflag (!%p128_p5), [#allocation3], %s133_s20  ;;  %s137_s28 = scalar_lea.vmem (!%p128_p5), [#allocation2], %s312_s24 }
  0x39   : > { %504 = dma.done.wait (%p744_p6), %s134_s27, 256  }
  0x3a   : > { %506 = vsyncadd (%p744_p6), %s134_s27, 4294967040  ;;  %s153_s26 = sand.u32 1, %s518_s7   ;;  %vm164_vm0 = vcmask 254976   ;;  %s314_s25 = sshll.u32 %s534_s11, 4  ;;  %v168_v0 = vlaneseq  ;;  %v547_v3 = vmov 0.0   ;;  %vm185_vm2 = vcmask 261120  }
  0x3b   : > { %s313_s29 = sshll.u32 %s153_s26, 1  ;;  %v171_v1 = vstv %s314_s25  ;;  %v176_v7 = vld [vmem:[%s137_s28] sm:$0xff]  ;;  %v177_v8 = vld [vmem:[%s137_s28 + $0x8] sm:$0xff]  ;;  %vm196_vm4 = vcmask 253952   ;;  %s316_s18 = sshll.u32 %s534_s11, 5 }
  0x3c   : > { %v169_v2 = vshrl.u32 %v168_v0, 7  ;;  %s666_s30 = scalar_lea.vmem [#allocation5], %s313_s29  ;;  %s677_s5 = scalar_lea.hbm %s734_s1, %s316_s18 }
  0x3d   : > { %165 = vst.msk [vmem:[%s666_s30] sm:$0x3] %vm164_vm0, %v547_v3  ;;  %s226_s2 = sshll.u32 %s666_s30, 4  ;;  %s213_s9 = scalar_lea.sflag [#allocation4], %s153_s26  ;;  %s679_s2 = int_to_ptr.vmem [resolvable:$true] %s226_s2 }
  0x3e   : > { %v170_v4 = vadd.s32 8, %v169_v2  ;;  %v172_v5 = vadd.s32 %v171_v1, %v169_v2  ;;  %s439_s14 = scalar_lea.vmem %s679_s2, 32  ;;  %p745_p13 = scmp.ne.s32.totalorder %s740_s22, 0 }
  0x3f   : > { %p440_p12 = scmp.ne.s32.totalorder %s679_s2, %s439_s14  ;;  %s548_s11 = smov [#allocation5]  }
  0x40   : > { %v173_v6 = vadd.s32 %v171_v1, %v170_v4  ;;  %vm174_vm1 = vcmp.lt.s32.totalorder %v172_v5, 16  ;;  %s443_s15 = sshll.u32 %s548_s11, 4  ;;  %s444_s15 = int_to_ptr.vmem [resolvable:$false] %s443_s15 }
  0x41   : > { %v182_v9 = vsel %vm174_vm1, %v176_v7, 0.0  ;;  %p441_p0 = pnand %p440_p12, %p745_p13  ;;  %s445_s17 = scalar_lea.vmem %s444_s15, 64 }
  0x42   : > { %vm175_vm3 = vcmp.lt.s32.totalorder %v173_v6, 16  ;;  %v186_v11 = vsel %vm185_vm2, %v182_v9, 0.0  ;;  %v199_v12 = vmul.f32 %v182_v9, %v182_v9  ;;  %p446_p4 = scmp.lt.s32.totalorder %s679_s2, %s444_s15  ;;  %p447_p10 = scmp.lt.s32.totalorder %s445_s17, %s439_s14 }
  0x43   : > { %v183_v10 = vsel %vm175_vm3, %v177_v8, 0.0  ;;  %p442_p2 = pneg %p441_p0 }
  0x44   : > { %v187_v13 = vsel %vm185_vm2, %v183_v10, 0.0  ;;  %v200_v14 = vmul.f32 %v183_v10, %v183_v10  ;;  %v201_v16 = vsel %vm185_vm2, %v199_v12, 0.0  ;;  %v184_v28 = vld [vmem:[%s666_s30] sm:$0x1]  ;;  %v198_v31 = vld [vmem:[%s666_s30 + $0x1] sm:$0x1]  ;;  %p448_p11 = por %p447_p10, %p446_p4 }
  0x45   : > { %v188_v15 = vadd.f32 %v187_v13, %v186_v11 }
  0x46   : > { %v202_v17 = vsel %vm185_vm2, %v200_v14, 0.0  ;;  %p449_p1 = pnand %p448_p11, %p442_p2 }
  0x47   : > { %v189_v18 = vrot.slane %v188_v15, 4  ;;  %v203_v19 = vadd.f32 %v202_v17, %v201_v16 }
  0x49   : > { %v190_v20 = vadd.f32 %v189_v18, %v188_v15  ;;  %v204_v21 = vrot.slane %v203_v19, 4 }
  0x4b   : > { %v191_v22 = vrot.slane %v190_v20, 2  ;;  %v205_v23 = vadd.f32 %v204_v21, %v203_v19 }
  0x4d   : > { %v192_v24 = vadd.f32 %v191_v22, %v190_v20  ;;  %v206_v25 = vrot.slane %v205_v23, 2 }
  0x4f   : > { %v193_v26 = vrot.slane %v192_v24, 1  ;;  %v207_v27 = vadd.f32 %v206_v25, %v205_v23 }
  0x51   : > { %v194_v29 = vadd.f32 %v193_v26, %v192_v24  ;;  %v208_v30 = vrot.slane %v207_v27, 1 }
  0x53   : > { %v195_v32 = vadd.f32 %v194_v29, %v184_v28  ;;  %v209_v33 = vadd.f32 %v208_v30, %v207_v27 }
  0x55   : > { %197 = vst.msk [vmem:[%s666_s30] sm:$0x1] %vm196_vm4, %v195_v32  ;;  %v210_v34 = vadd.f32 %v209_v33, %v198_v31 }
  0x57   : > { %211 = vst.msk [vmem:[%s666_s30 + $0x1] sm:$0x1] %vm196_vm4, %v210_v34 }
  0x58   : > { %452 = shalt.err (!%p449_p1)
}
  0x59   : > { %s453_s19 = scalar_lea.hbm %s677_s5, 32  ;;  %s457_s27 = scalar_lea.hbm %s734_s1, 64 }
  0x5a   : > { %p454_p3 = scmp.ne.s32.totalorder %s677_s5, %s453_s19  ;;  %p458_p9 = scmp.lt.u32.totalorder %s677_s5, %s734_s1 }
  0x5b   : > { %p459_p5 = scmp.lt.u32.totalorder %s457_s27, %s453_s19  ;;  %p461_p12 = scmp.lt.u32.totalorder %s453_s19, %s677_s5 }
  0x5c   : > { %p455_p7 = pnand %p454_p3, %p745_p13 }
  0x5d   : > { %p460_p6 = por %p459_p5, %p458_p9 }
  0x5e   : > { %p456_p8 = pneg %p455_p7 }
  0x5f   : > { %p462_p0 = por %p461_p12, %p460_p6 }
  0x61   : > { %p463_p2 = pnand %p462_p0, %p456_p8 }
  0x63   : > { %466 = shalt.err (!%p463_p2)
}
  0x64   : > { %322 = dma.vmem_to_hbm [thread:$0]  (%p745_p13), %s679_s2, 32, %s677_s5, %s213_s9  }
  0x65 PF: > { %s238_s25 = sand.u32 1, %s514_s6   ;;  %p746_p4 = scmp.ne.s32.totalorder %s741_s23, 0 }
  0x66   : > { %p747_p10 = scmp.ge.s32.totalorder %s542_s13, 2  ;;  %s239_s29 = scalar_lea.sflag [#allocation4], %s238_s25 }
  0x68   : > { %p329_p11 = pnand %p747_p10, %p746_p4 }
  0x6a   : > { %508 = dma.done.wait (!%p329_p11), %s239_s29, 32  }
  0x6b   : > { %510 = vsyncadd (!%p329_p11), %s239_s29, 4294967264  ;;  %s17_s13 = sadd.s32 1, %s542_s13   ;;  %s748_s6 = smov %s518_s7 }
  0x6c   : > { %p14_p1 = scmp.ge.s32.totalorder %s17_s13, 4   ;;  %s749_s7 = smov %s522_s8 }
  0x6d   : > { %s750_s8 = smov %s617_s21  ;;  %s751_s9 = smov %s530_s10 }
  0x6e   : > { %s723_s10 = smov 0   ;;  %s752_s11 = smov %s538_s12 }
  0x6f   : > { %s753_s12 = smov %s755_s16  ;;  %16 = sbr.rel (!%p14_p1) target bundleno = 7 (0x7), region = 73 }
  0x76   :  { %244 = vsyncpa [#allocation3], 1 }
  0x77   :  { %246 = vsyncpa [#allocation3 + $0x1], 1 }
  0x78   :  { %247 = vsyncpa [#allocation4], 1 }
  0x79   :  { %249 = vsyncpa [#allocation4 + $0x1], 1 }

</bundles_post_ra>
